<compile_context>
chip_gen: v7x
topology: tpu7x:2x2x1
jax: 0.10.0
libtpu: 0.0.40
codegen_flags: <defaults>
</compile_context>

<pallas_src>
import functools

import jax
import jax.numpy as jnp
from jax.experimental import pallas as pl
from jax.experimental.pallas import tpu as pltpu

_MIB = 1024 * 1024


def _pooler_kernel(h_ref, w_ref, b_ref, o_ref, acc_ref, *,
                   inv_seq_len, seq_len, seq_tile):
    # h_ref: (TB, TS, H)   w_ref: (H, Hp)   b_ref: (1, Hp)
    # o_ref: (TB, Hp)      acc_ref: f32 (TB, H) scratch (lives across the seq axis)
    s = pl.program_id(1)
    last = pl.num_programs(1) - 1

    @pl.when(s == 0)
    def _init():
        acc_ref[...] = jnp.zeros_like(acc_ref)

    rem = seq_len % seq_tile        # static: > 0 only when the last seq tile is ragged
    if rem == 0:
        acc_ref[...] += jnp.sum(h_ref[...], axis=1, dtype=jnp.float32)
    else:
        @pl.when(s != last)
        def _full_tile():
            acc_ref[...] += jnp.sum(h_ref[...], axis=1, dtype=jnp.float32)

        @pl.when(s == last)
        def _ragged_tile():
            h = h_ref[...]
            seq_idx = jax.lax.broadcasted_iota(jnp.int32, h.shape, 1)
            h = jnp.where(seq_idx < rem, h, jnp.zeros_like(h))
            acc_ref[...] += jnp.sum(h, axis=1, dtype=jnp.float32)

    @pl.when(s == last)
    def _finalize():
        # Scale once per output tile (not per streamed tile).
        mean_h = acc_ref[...] * inv_seq_len
        # Native-dtype operands into the MXU with f32 accumulation.  (With bf16
        # weights the mean is rounded to bf16 here -- standard practice.)
        y = jnp.dot(mean_h.astype(w_ref.dtype), w_ref[...],
                    preferred_element_type=jnp.float32)
        y = y + b_ref[...].astype(jnp.float32)
        o_ref[...] = jnp.tanh(y).astype(o_ref.dtype)


def _round_up(x, m):
    return ((x + m - 1) // m) * m


def _round_down(x, m):
    return (x // m) * m


def _vmem_capacity_bytes():
    try:
        return int(pltpu.get_tpu_info().vmem_capacity_bytes)
    except Exception:
        return 64 * _MIB   # conservative (v7x-sized) fallback


def _choose_tiles(B, S, H, Hp, act_it, w_it, out_it, budget):
    """Pick (TB, TS) so the steady-state VMEM working set fits `budget`."""

    def fixed_cost(tb):
        return (2 * H * Hp * w_it          # resident weight (worst case: 2 buffers)
                + 2 * 8 * Hp * w_it        # bias, padded to 8 sublanes
                + 2 * tb * Hp * out_it     # output double buffer
                + tb * Hp * 4)             # f32 accumulator scratch

    def max_ts(tb):
        rem = budget - fixed_cost(tb)
        per_row = 2 * tb * H * act_it      # double-buffered activation bytes per seq row
        if per_row <= 0:
            return S
        return max(rem // per_row, 0)

    # Candidate batch tiles, largest first.  When B >= 16, force at least two
    # batch grid steps so v7x's second TensorCore gets work on the "parallel"
    # axis; all tiled TBs are multiples of 8 (output block legality).
    if B >= 16:
        top = _round_up(min(B, _round_up(-(-B // 2), 8)), 8)
        cands, t = [], top
        while True:
            cands.append(t)
            if t <= 8:
                break
            t = max(8, _round_down(t // 2, 8))
    else:
        cands = [B]

    # Prefer the largest TB that still allows a full-S seq tile: no ragged tile,
    # no in-kernel masking, biggest per-step DMA.
    for tb in cands:
        if max_ts(tb) >= S:
            return tb, S
    # Otherwise the largest TB whose best multiple-of-8 seq tile fits.
    for tb in cands:
        ts = max_ts(tb)
        if ts >= 8:
            return tb, int(min(_round_down(ts, 8), _round_down(S, 8)))
    # Pathological fallback (enormous H): smallest legal tiles.
    return cands[-1], (S if S < 8 else 8)


def roberta_pooler_mod(hidden_states, weight, bias):
    """hidden_states: (B, S, H); weight: (H_in, H_out) [transposed from PyTorch's
    (out, in) layout]; bias: (H,).  Returns (B, H)."""
    B, S, H = hidden_states.shape
    Hp = _round_up(H, 128)                  # lane-dense matmul output

    act_it = hidden_states.dtype.itemsize
    w_it = weight.dtype.itemsize
    out_it = act_it

    # Per-chip VMEM budget: leave headroom under 64 MiB (v7x); use most of the
    # 128 MiB on v5e / v6e.
    vmem_cap = _vmem_capacity_bytes()
    if vmem_cap <= 64 * _MIB:
        tile_budget, vmem_limit = 40 * _MIB, 56 * _MIB
    else:
        tile_budget, vmem_limit = 88 * _MIB, 108 * _MIB

    TB, TS = _choose_tiles(B, S, H, Hp, act_it, w_it, out_it, tile_budget)

    # Only the tiny parameters get padded (zero columns -> zero extra outputs,
    # sliced off below).  The large (B, S, H) activation stream is NOT padded,
    # avoiding a full extra HBM copy.
    w = weight if Hp == H else jnp.pad(weight, ((0, 0), (0, Hp - H)))
    b2d = (bias if Hp == H else jnp.pad(bias, (0, Hp - H))).reshape(1, Hp)

    grid = (pl.cdiv(B, TB), pl.cdiv(S, TS))

    est = (2 * TB * TS * H * act_it + 2 * H * Hp * w_it + 2 * 8 * Hp * w_it
           + 2 * TB * Hp * out_it + TB * Hp * 4)
    vmem_limit = int(min(max(vmem_limit, est + 4 * _MIB), vmem_cap))

    kernel = functools.partial(_pooler_kernel, inv_seq_len=1.0 / S,
                               seq_len=S, seq_tile=TS)

    out = pl.pallas_call(
        kernel,
        out_shape=jax.ShapeDtypeStruct((B, Hp), hidden_states.dtype),
        grid_spec=pltpu.PrefetchScalarGridSpec(
            num_scalar_prefetch=0,
            grid=grid,
            in_specs=[
                pl.BlockSpec((TB, TS, H), lambda bi, si: (bi, si, 0)),
                pl.BlockSpec((H, Hp), lambda bi, si: (0, 0)),    # weight: resident
                pl.BlockSpec((1, Hp), lambda bi, si: (0, 0)),    # bias: resident
            ],
            out_specs=pl.BlockSpec((TB, Hp), lambda bi, si: (bi, 0)),
            scratch_shapes=[pltpu.VMEM((TB, H), jnp.float32)],
        ),
        compiler_params=pltpu.CompilerParams(
            dimension_semantics=("parallel", "arbitrary"),
            vmem_limit_bytes=vmem_limit,
        ),
    )(hidden_states, w, b2d)

    return out if Hp == H else out[:, :H]


def reference(hidden_states, weight, bias):
    mean_h = jnp.mean(hidden_states.astype(jnp.float32), axis=1)
    return jnp.tanh(mean_h @ weight.astype(jnp.float32) + bias.astype(jnp.float32))


if __name__ == "__main__":
    # config.hidden_size = 32, batch = 2, seq = 8
    B, S, H = 2, 8, 32
    key = jax.random.PRNGKey(0)
    k_h, k_w, k_b = jax.random.split(key, 3)

    hidden_states = jax.random.normal(k_h, (B, S, H), dtype=jnp.float32)
    # Deterministic synthetic params (stored pre-transposed as (in, out)).
    weight = jax.random.normal(k_w, (H, H), dtype=jnp.float32) * 0.02
    bias = jax.random.normal(k_b, (H,), dtype=jnp.float32) * 0.02

    out = roberta_pooler_mod(hidden_states, weight, bias)
    out = jax.block_until_ready(out)

    ref = reference(hidden_states, weight, bias)
    assert out.shape == (B, H)
    assert jnp.allclose(out, ref, atol=1e-5, rtol=1e-5), "mismatch vs reference"

    print("KERNEL_OK")
</pallas_src>

<mosaic_0001>
module attributes {stable_mosaic.version = 11 : i64} {
  func.func @_pooler_kernel(%arg0: i32, %arg1: i32, %arg2: memref<2x8x32xf32, #tpu.memory_space<vmem>>, %arg3: memref<32x128xf32, #tpu.memory_space<vmem>>, %arg4: memref<1x128xf32, #tpu.memory_space<vmem>>, %arg5: memref<2x128xf32, #tpu.memory_space<vmem>>, %arg6: memref<2x32xf32, #tpu.memory_space<vmem>>) attributes {dimension_semantics = [#tpu.dimension_semantics<parallel>, #tpu.dimension_semantics<arbitrary>], iteration_bounds = array<i64: 1, 1>, scalar_prefetch = 0 : i64, scratch_operands = 1 : i64, tpu.core_type = #tpu.core_type<tc>, window_params = [{transform_indices = @transform_0, window_bounds = array<i64: 2, 8, 32>}, {pipeline_mode = #tpu.pipeline_mode<synchronous>, transform_indices = @transform_1, window_bounds = array<i64: 32, 128>}, {pipeline_mode = #tpu.pipeline_mode<synchronous>, transform_indices = @transform_2, window_bounds = array<i64: 1, 128>}, {transform_indices = @transform_3, window_bounds = array<i64: 2, 128>}]} {
    %c0_i32 = arith.constant 0 : i32
    %0 = arith.cmpi eq, %arg1, %c0_i32 : i32
    %1 = arith.extui %0 : i1 to i32
    %c0_i32_0 = arith.constant 0 : i32
    %2 = arith.cmpi ne, %1, %c0_i32_0 : i32
    scf.if %2 {
      %cst_9 = arith.constant 0.000000e+00 : f32
      %11 = vector.broadcast %cst_9 : f32 to vector<2x32xf32>
      %c0_10 = arith.constant 0 : index
      %c0_11 = arith.constant 0 : index
      %12 = vector.load %arg6[%c0_10, %c0_11] : memref<2x32xf32, #tpu.memory_space<vmem>>, vector<2x32xf32>
      tpu.vector_store %arg6[%c0_10, %c0_11], %11 {strides = array<i32>} : memref<2x32xf32, #tpu.memory_space<vmem>>, vector<2x32xf32>,
    } else {
    }
    %c0 = arith.constant 0 : index
    %c0_1 = arith.constant 0 : index
    %3 = vector.load %arg6[%c0, %c0_1] : memref<2x32xf32, #tpu.memory_space<vmem>>, vector<2x32xf32>
    %c0_2 = arith.constant 0 : index
    %c0_3 = arith.constant 0 : index
    %c0_4 = arith.constant 0 : index
    %4 = vector.load %arg2[%c0_2, %c0_3, %c0_4] : memref<2x8x32xf32, #tpu.memory_space<vmem>>, vector<2x8x32xf32>
    %cst = arith.constant dense<0.000000e+00> : vector<2x32xf32>
    %5 = vector.multi_reduction <add>, %4, %cst [1] : vector<2x8x32xf32> to vector<2x32xf32>
    %6 = arith.addf %3, %5 : vector<2x32xf32>
    %c0_5 = arith.constant 0 : index
    %c0_6 = arith.constant 0 : index
    %7 = vector.load %arg6[%c0_5, %c0_6] : memref<2x32xf32, #tpu.memory_space<vmem>>, vector<2x32xf32>
    tpu.vector_store %arg6[%c0_5, %c0_6], %6 {strides = array<i32>} : memref<2x32xf32, #tpu.memory_space<vmem>>, vector<2x32xf32>,
    %c0_i32_7 = arith.constant 0 : i32
    %8 = arith.cmpi eq, %arg1, %c0_i32_7 : i32
    %9 = arith.extui %8 : i1 to i32
    %c0_i32_8 = arith.constant 0 : i32
    %10 = arith.cmpi ne, %9, %c0_i32_8 : i32
    scf.if %10 {
      %c0_9 = arith.constant 0 : index
      %c0_10 = arith.constant 0 : index
      %11 = vector.load %arg6[%c0_9, %c0_10] : memref<2x32xf32, #tpu.memory_space<vmem>>, vector<2x32xf32>
      %cst_11 = arith.constant 1.250000e-01 : f32
      %12 = vector.broadcast %cst_11 : f32 to vector<2x32xf32>
      %13 = arith.mulf %11, %12 : vector<2x32xf32>
      %c0_12 = arith.constant 0 : index
      %c0_13 = arith.constant 0 : index
      %14 = vector.load %arg3[%c0_12, %c0_13] : memref<32x128xf32, #tpu.memory_space<vmem>>, vector<32x128xf32>
      %cst_14 = arith.constant dense<0.000000e+00> : vector<2x128xf32>
      %15 = tpu.matmul %13, %14, %cst_14 {dimension_numbers = #tpu.dot_dimension_numbers<[1], [0], [0], [1], [0, 0, 1, 1], [], []>} : vector<2x32xf32>, vector<32x128xf32>, vector<2x128xf32> -> vector<2x128xf32>
      %c0_15 = arith.constant 0 : index
      %c0_16 = arith.constant 0 : index
      %16 = vector.load %arg4[%c0_15, %c0_16] : memref<1x128xf32, #tpu.memory_space<vmem>>, vector<1x128xf32>
      %17 = vector.broadcast %16 : vector<1x128xf32> to vector<2x128xf32>
      %18 = arith.addf %15, %17 : vector<2x128xf32>
      %19 = math.tanh %18 : vector<2x128xf32>
      %c0_17 = arith.constant 0 : index
      %c0_18 = arith.constant 0 : index
      %20 = vector.load %arg5[%c0_17, %c0_18] : memref<2x128xf32, #tpu.memory_space<vmem>>, vector<2x128xf32>
      tpu.vector_store %arg5[%c0_17, %c0_18], %19 {strides = array<i32>} : memref<2x128xf32, #tpu.memory_space<vmem>>, vector<2x128xf32>,
    } else {
    }
    return
  }
  func.func @transform_0(%arg0: i32, %arg1: i32) -> (i32, i32, i32) {
    %c0_i32 = arith.constant 0 : i32
    %c0_i32_0 = arith.constant 0 : i32
    return %arg0, %arg1, %c0_i32 : i32, i32, i32
  }
  func.func @transform_1(%arg0: i32, %arg1: i32) -> (i32, i32) {
    %c0_i32 = arith.constant 0 : i32
    %c0_i32_0 = arith.constant 0 : i32
    %c0_i32_1 = arith.constant 0 : i32
    return %c0_i32, %c0_i32_0 : i32, i32
  }
  func.func @transform_2(%arg0: i32, %arg1: i32) -> (i32, i32) {
    %c0_i32 = arith.constant 0 : i32
    %c0_i32_0 = arith.constant 0 : i32
    %c0_i32_1 = arith.constant 0 : i32
    return %c0_i32, %c0_i32_0 : i32, i32
  }
  func.func @transform_3(%arg0: i32, %arg1: i32) -> (i32, i32) {
    %c0_i32 = arith.constant 0 : i32
    %c0_i32_0 = arith.constant 0 : i32
    return %arg0, %c0_i32 : i32, i32
  }
}

</mosaic_0001>

<bundles_post_ra>
// kernel: tpu_custom_call.1
= control target key start
LH: loop header
LB: loop body
LE: loop exit
PB: predicated region body
PF: predicated region fallthrough
CT: control target
= control target key end

     0   :  { %8 = vsyncpa [#allocation4], 0  ;;  %s360_s0 = inlined_call_operand.hbm [shape: f32[2,8,32], index: 0, kind: input, shape index: {}]   ;;  %s361_s1 = inlined_call_operand.hbm [shape: f32[32,128], index: 1, kind: input, shape index: {}]   ;;  %s362_s2 = inlined_call_operand.vmem [shape: f32[1,128], index: 2, kind: input, shape index: {}]   ;;  %s363_s3 = inlined_call_operand.hbm [shape: f32[2,128], index: 3, kind: output, shape index: {}]  }
   0x1   :  { %9 = vsyncpa [#allocation7], 0 }
   0x2   :  { %10 = vsyncpa [#allocation5], 0  ;;  %s288_s12 = smov [#allocation3]   ;;  %s216_s16 = scalar_lea.hbm %s360_s0, 256 }
   0x3   :  { %s16_s13 = sshll.u32 %s288_s12, 4  ;;  %p217_p0 = scmp.ne.s32.totalorder %s360_s0, %s216_s16  ;;  %s17_s13 = int_to_ptr.vmem [resolvable:$true] %s16_s13 }
   0x4   :  { %p220_p1 = scmp.lt.u32.totalorder %s216_s16, %s360_s0 }
   0x6   :  { %p222_p2 = pnand %p220_p1, %p217_p0 }
   0x8   :  { %225 = shalt.err (!%p222_p2)
}
   0x9   :  { %s226_s21 = scalar_lea.vmem %s17_s13, 256  ;;  %p231_p4 = scmp.lt.s32.totalorder %s17_s13, %s17_s13 }
   0xa   :  { %p227_p3 = scmp.ne.s32.totalorder %s17_s13, %s226_s21  ;;  %p232_p5 = scmp.lt.s32.totalorder %s226_s21, %s226_s21 }
   0xc   :  { %p233_p6 = por %p232_p5, %p231_p4 }
   0xe   :  { %p234_p7 = pnand %p233_p6, %p227_p3 }
  0x10   :  { %237 = shalt.err (!%p234_p7)
}
  0x11   :  { %s289_s22 = smov 128   ;;  %s290_s23 = smov 8  }
  0x12   :  { %22 = dma.hbm_to_vmem [thread:$0]  %s360_s0, 256, %s17_s13, [#allocation4], %s289_s22, %s289_s22, %s290_s23  }
  0x13   :  { %s291_s26 = smov [#allocation6]   ;;  %s238_s30 = scalar_lea.hbm %s361_s1, 512 }
  0x14   :  { %s28_s27 = sshll.u32 %s291_s26, 4  ;;  %p239_p8 = scmp.ne.s32.totalorder %s361_s1, %s238_s30  ;;  %s29_s27 = int_to_ptr.vmem [resolvable:$true] %s28_s27 }
  0x15   :  { %p242_p9 = scmp.lt.u32.totalorder %s238_s30, %s361_s1 }
  0x17   :  { %p244_p10 = pnand %p242_p9, %p239_p8 }
  0x19   :  { %247 = shalt.err (!%p244_p10)
}
  0x1a   :  { %s248_s8 = scalar_lea.vmem %s29_s27, 512  ;;  %p253_p12 = scmp.lt.s32.totalorder %s29_s27, %s29_s27 }
  0x1b   :  { %p249_p11 = scmp.ne.s32.totalorder %s29_s27, %s248_s8  ;;  %p254_p13 = scmp.lt.s32.totalorder %s248_s8, %s248_s8 }
  0x1d   :  { %p255_p0 = por %p254_p13, %p253_p12 }
  0x1f   :  { %p256_p1 = pnand %p255_p0, %p249_p11 }
  0x21   :  { %259 = shalt.err (!%p256_p1)
}
  0x22   :  { %34 = dma.hbm_to_vmem [thread:$0]  %s361_s1, 512, %s29_s27, [#allocation7], %s289_s22, %s289_s22, %s290_s23  }
  0x23   :  { %282 = dma.done.wait [#allocation4], 256  }
  0x24   :  { %283 = vsyncadd [#allocation4], 4294967040 }
  0x25   :  { %284 = dma.done.wait [#allocation7], 512  }
  0x26   :  { %285 = vsyncadd [#allocation7], 4294966784  ;;  %vm47_vm0 = vcmask 254976   ;;  %v292_v0 = vmov 0.0|0.0   ;;  %v293_v1 = vmov 0.0   ;;  %vm294_vm1 = vmmov 0  }
  0x27   :  { %200 = vmatprep.subr.bf16.mxu0 %v292_v0  ;;  %48 = vst.msk [vmem:[#allocation2] sm:$0x3] %vm47_vm0, %v293_v1  ;;  %197 = vmatprep.mubr.msk.f32.mxu0 %vm294_vm1, %v293_v1  ;;  %vm52_vm2 = vcmask 261120   ;;  %v80_v2 = vld [vmem:[#allocation6] sm:$0xff]  ;;  %v81_v3 = vld [vmem:[#allocation6 + $0x8] sm:$0xff]  ;;  %v82_v4 = vld [vmem:[#allocation6 + $0x10] sm:$0xff] }
  0x28   :  { %v201_v5 = vpack.c.bf16 %v81_v3, %v80_v2  ;;  %v83_v6 = vld [vmem:[#allocation6 + $0x18] sm:$0xff]  ;;  %v50_v7 = vld [vmem:[#allocation3] sm:$0xff]  ;;  %vm69_vm3 = vcmask 1041409   ;;  %v182_v29 = vld [vmem:[%s362_s2] ss:$0 sm:$0xff]  ;;  %s295_s11 = smov [#allocation8]  }
  0x29   :  { %v51_v8 = vld [vmem:[#allocation3 + $0x8] sm:$0xff]  ;;  %v53_v9 = vsel %vm52_vm2, %v50_v7, 0.0  ;;  %v204_v10 = vpack.c.bf16 %v83_v6, %v82_v4  ;;  %s172_s12 = sshll.u32 %s295_s11, 4  ;;  %s173_s12 = int_to_ptr.vmem [resolvable:$true] %s172_s12 }
  0x2a   :  { %202 = vmatpush3.bf16.msra.mxu0 %v201_v5  ;;  %v54_v11 = vrot.slane %v53_v9, 4  ;;  %v60_v12 = vsel %vm52_vm2, %v51_v8, 0.0  ;;  %s260_s13 = scalar_lea.vmem %s173_s12, 32  ;;  %p265_p3 = scmp.lt.s32.totalorder %s173_s12, %s173_s12 }
  0x2b   :  { %203 = vmatprep.subr.bf16.mxu0 %v292_v0  ;;  %v61_v13 = vrot.slane %v60_v12, 4  ;;  %p261_p2 = scmp.ne.s32.totalorder %s173_s12, %s260_s13  ;;  %p266_p4 = scmp.lt.s32.totalorder %s260_s13, %s260_s13 }
  0x2c   :  { %v55_v14 = vadd.f32 %v54_v11, %v53_v9 }
  0x2d   :  { %v62_v15 = vadd.f32 %v61_v13, %v60_v12  ;;  %p267_p5 = por %p266_p4, %p265_p3 }
  0x2e   :  { %205 = vmatpush3.bf16.msra.mxu0 %v204_v10  ;;  %v56_v16 = vrot.slane %v55_v14, 2  ;;  %v49_v23 = vld [vmem:[#allocation2] sm:$0x3] }
  0x2f   :  { %v63_v17 = vrot.slane %v62_v15, 2  ;;  %p268_p6 = pnand %p267_p5, %p261_p2 }
  0x30   :  { %v57_v18 = vadd.f32 %v56_v16, %v55_v14 }
  0x31   :  { %v64_v19 = vadd.f32 %v63_v17, %v62_v15 }
  0x32   :  { %v58_v20 = vrot.slane %v57_v18, 1 }
  0x33   :  { %v65_v21 = vrot.slane %v64_v19, 1 }
  0x34   :  { %v59_v22 = vadd.f32 %v58_v20, %v57_v18 }
  0x35   :  { %v66_v24 = vadd.f32 %v65_v21, %v64_v19 }
  0x37   :  { %v70_v25 = vsel %vm69_vm3, %v66_v24, %v59_v22 }
  0x38   :  { %v72_v26 = vadd.f32 %v70_v25, %v49_v23 }
  0x3a   :  { %74 = vst.msk [vmem:[#allocation2] sm:$0x3] %vm47_vm0, %v72_v26 }
  0x41   :  { %v78_v27 = vld [vmem:[#allocation2] sm:$0x3] }
  0x42   :  { %v79_v28 = vmul.f32 0.125, %v78_v27 }
  0x44   :  { %198 = vmatmul.mubr.msk.f32.vlgmr.msra.gmra.mrb[0].mxu0 %vm52_vm2, %v79_v28 }
 0x117   :  { %v160_v30 = vpop.f32.mrb[0].mxu0 }
 0x118   :  { %v161_v31 = vadd.f32 %v182_v29, %v160_v30  ;;  %v199_v32 = vpop.f32.mrb[1].mxu0 }
 0x11a   :  { %214 = vtanh.f32 %v161_v31 }
 0x124   :  { %v215_v33 = vpop.eup %214 }
 0x125   :  { %165 = vst [vmem:[#allocation8] sm:$0x3] %v215_v33 }
 0x126   :  { %271 = shalt.err (!%p268_p6)
}
 0x127   :  { %s272_s2 = scalar_lea.hbm %s363_s3, 32 }
 0x128   :  { %p273_p7 = scmp.ne.s32.totalorder %s363_s3, %s272_s2  ;;  %p276_p8 = scmp.lt.u32.totalorder %s272_s2, %s363_s3 }
 0x12a   :  { %p278_p9 = pnand %p276_p8, %p273_p7 }
 0x12c   :  { %281 = shalt.err (!%p278_p9)
}
 0x12d   :  { %175 = dma.vmem_to_hbm [thread:$0]  %s173_s12, 32, %s363_s3, [#allocation5]  }
 0x12e   :  { %286 = dma.done.wait [#allocation5], 32  }
 0x12f   :  { %287 = vsyncadd [#allocation5], 4294967264 }
 0x130   :  { %179 = vsyncpa [#allocation4], 1 }
 0x131   :  { %180 = vsyncpa [#allocation7], 1 }
 0x132   :  { %181 = vsyncpa [#allocation5], 1 }

</bundles_post_ra>
